<compile_context>
chip_gen: v7x
topology: tpu7x:2x2x1
jax: 0.10.0
libtpu: 0.0.40
codegen_flags: <defaults>
</compile_context>

<pallas_src>
import numpy as np
import jax
import jax.numpy as jnp
from jax.experimental import pallas as pl
from jax.experimental.pallas import tpu as pltpu


def _round_up(x: int, m: int) -> int:
    return ((x + m - 1) // m) * m


def adaptive_avgpool_matrix(length: int, out_size: int) -> np.ndarray:
    """Static matrix P such that  x @ P  ==  AdaptiveAvgPool1d(out_size)(x)."""
    P = np.zeros((length, out_size), dtype=np.float32)
    for i in range(out_size):
        start = (i * length) // out_size
        end = -((-(i + 1) * length) // out_size)  # ceil((i+1)*L/out)
        P[start:end, i] = 1.0 / (end - start)
    return P


def _vmem_limit_bytes() -> int:
    """Per-core VMEM budget: physical capacity minus headroom, capped at ~110 MiB.

    v7x (64 MiB/TC) -> ~52 MiB; v5e/v6e (128 MiB) -> ~110 MiB.
    """
    cap = 128 * 1024 * 1024
    try:
        cap = int(pltpu.get_tpu_info().vmem_capacity_bytes)
    except Exception:
        pass
    return max(32 * 1024 * 1024, min(cap - 12 * 1024 * 1024, 110 * 1024 * 1024))


def _choose_tm(M: int, tm: int) -> int:
    """Row tile: <= M (rounded to sublanes) and giving >= 2 grid steps when possible."""
    if M <= 8:
        return M  # single tiny block == full row dim (legal block shape)
    tm = min(tm, _round_up(M, 8))
    if pl.cdiv(M, tm) < 2:
        # Ensure both v7x TensorCores get at least one row tile.
        tm = max(8, _round_up(pl.cdiv(M, 2), 8))
    return tm


# ---------------------------------------------------------------------------
# Kernels
# ---------------------------------------------------------------------------

def _mlp_kernel_resident(x_ref, w1_ref, b1_ref, pool_ref, o_ref):
    # fc1 on the MXU: per-tile bf16 cast of the activations, f32 accumulation.
    h = jnp.dot(x_ref[...].astype(w1_ref.dtype), w1_ref[...],
                preferred_element_type=jnp.float32)
    # Bias + ReLU epilogue in f32 on the VPU.  dropout(p=0.0) == identity.
    h = jnp.maximum(h + b1_ref[...], 0.0)
    # AdaptiveAvgPool1d as an exact f32 matmul with the static pooling matrix.
    y = jnp.dot(h, pool_ref[...], preferred_element_type=jnp.float32)
    o_ref[...] = y.astype(o_ref.dtype)


def _mlp_kernel_hsplit(x_ref, w1_ref, b1_ref, pool_ref, o_ref, acc_ref):
    # Hidden-dim reduction axis: y += relu(x @ W1[:, blk] + b1[blk]) @ P[blk, :].
    j = pl.program_id(1)

    @pl.when(j == 0)
    def _():
        acc_ref[...] = jnp.zeros_like(acc_ref)

    h = jnp.dot(x_ref[...].astype(w1_ref.dtype), w1_ref[...],
                preferred_element_type=jnp.float32)
    h = jnp.maximum(h + b1_ref[...], 0.0)
    acc_ref[...] += jnp.dot(h, pool_ref[...], preferred_element_type=jnp.float32)

    @pl.when(j == pl.num_programs(1) - 1)
    def _():
        o_ref[...] = acc_ref[...].astype(o_ref.dtype)


# ---------------------------------------------------------------------------
# One-time parameter preparation (hoisted out of the forward pass)
# ---------------------------------------------------------------------------

def prepare_mlp_params(w1, b1, out_features: int, *, compute_dtype=jnp.bfloat16,
                       hidden_block: int = 512, tm_hint: int = 256):
    """Prepare fc1 weight/bias + pooling matrix once; pick resident vs hidden-split plan."""
    F, H = w1.shape
    O = int(out_features)
    pool_np = adaptive_avgpool_matrix(H, O)

    budget = _vmem_limit_bytes()
    # Rough resident-plan footprint: single-buffered W1(bf16) + pool(f32) + bias,
    # double-buffered x/out tiles, plus the (tm, H) f32 intermediate.
    resident_bytes = (F * H * 2 + H * O * 4 + H * 4
                      + 2 * tm_hint * (F * 4 + O * 4) + tm_hint * H * 4)
    use_split = (H > hidden_block) and (resident_bytes > budget - (8 << 20))

    if use_split:
        # Pad the hidden dim (weights only, one-time) to a multiple of the hidden
        # tile; padded columns of W1/b1 give relu(0)=0 and padded pool rows are 0,
        # so the result is exact.
        H_pad = _round_up(H, hidden_block)
        w1_p = jnp.zeros((F, H_pad), compute_dtype).at[:, :H].set(
            w1.astype(compute_dtype))
        b1_p = jnp.zeros((1, H_pad), jnp.float32).at[0, :H].set(
            b1.astype(jnp.float32))
        pool_p = jnp.zeros((H_pad, O), jnp.float32).at[:H, :].set(
            jnp.asarray(pool_np))
        tn = hidden_block
    else:
        w1_p = w1.astype(compute_dtype)
        b1_p = b1.astype(jnp.float32).reshape(1, H)
        pool_p = jnp.asarray(pool_np)
        tn = None

    return {"w1": w1_p, "b1": b1_p, "pool": pool_p, "out_features": O, "tn": tn}


# ---------------------------------------------------------------------------
# Forward
# ---------------------------------------------------------------------------

def mlp_forward(x, params, *, tm: int = 256):
    """x: (B, S, in_features); params: from prepare_mlp_params()."""
    B, S, F = x.shape
    M = B * S
    O = params["out_features"]
    w1_p, b1_p, pool_p, tn = params["w1"], params["b1"], params["pool"], params["tn"]
    H_pad = w1_p.shape[1]

    # No copy / pad / cast of the activations: reshape only; cast happens in-kernel.
    x2 = x.reshape(M, F)
    tm = _choose_tm(M, tm)
    grid_m = pl.cdiv(M, tm)

    vmem_limit = _vmem_limit_bytes()
    cost = pl.CostEstimate(
        flops=2 * M * (F * H_pad + H_pad * O),
        transcendentals=0,
        bytes_accessed=(x2.size * x2.dtype.itemsize
                        + w1_p.size * w1_p.dtype.itemsize
                        + b1_p.size * 4 + pool_p.size * 4
                        + M * O * x.dtype.itemsize),
    )

    if tn is None:
        # ---- resident plan: full W1/pool kept in VMEM, single row-tile grid ----
        def run(single_buffer: bool):
            if single_buffer:
                # Constant index_map -> double-buffering buys nothing; halve VMEM.
                const = lambda shape: pl.BlockSpec(shape, lambda i: (0, 0),
                                                   pipeline_mode=pl.Buffered(1))
            else:
                const = lambda shape: pl.BlockSpec(shape, lambda i: (0, 0))
            return pl.pallas_call(
                _mlp_kernel_resident,
                out_shape=jax.ShapeDtypeStruct((M, O), x.dtype),
                grid_spec=pltpu.PrefetchScalarGridSpec(
                    num_scalar_prefetch=0,
                    grid=(grid_m,),
                    in_specs=[
                        pl.BlockSpec((tm, F), lambda i: (i, 0)),  # activations (streamed)
                        const((F, H_pad)),                         # fc1 weight (resident)
                        const((1, H_pad)),                         # fc1 bias (resident)
                        const((H_pad, O)),                         # pooling matrix (resident)
                    ],
                    out_specs=pl.BlockSpec((tm, O), lambda i: (i, 0)),
                ),
                compiler_params=pltpu.CompilerParams(
                    dimension_semantics=("parallel",),  # shard row tiles across TCs
                    vmem_limit_bytes=vmem_limit),
                cost_estimate=cost,
            )(x2, w1_p, b1_p, pool_p)

        try:
            out = run(single_buffer=True)
        except Exception:
            # Graceful fallback for jax versions without Buffered(1) support.
            out = run(single_buffer=False)
    else:
        # ---- hidden-split plan: reduction over tn-wide hidden blocks ----
        grid_h = H_pad // tn
        out = pl.pallas_call(
            _mlp_kernel_hsplit,
            out_shape=jax.ShapeDtypeStruct((M, O), x.dtype),
            grid_spec=pltpu.PrefetchScalarGridSpec(
                num_scalar_prefetch=0,
                grid=(grid_m, grid_h),
                in_specs=[
                    pl.BlockSpec((tm, F), lambda i, j: (i, 0)),
                    pl.BlockSpec((F, tn), lambda i, j: (0, j)),
                    pl.BlockSpec((1, tn), lambda i, j: (0, j)),
                    pl.BlockSpec((tn, O), lambda i, j: (j, 0)),
                ],
                out_specs=pl.BlockSpec((tm, O), lambda i, j: (i, 0)),
                scratch_shapes=[pltpu.VMEM((tm, O), jnp.float32)],
            ),
            compiler_params=pltpu.CompilerParams(
                dimension_semantics=("parallel", "arbitrary"),
                vmem_limit_bytes=vmem_limit),
            cost_estimate=cost,
        )(x2, w1_p, b1_p, pool_p)

    return out.reshape(B, S, O)


# ---------------------------------------------------------------------------
# References
# ---------------------------------------------------------------------------

def mlp_reference_f32(x, w1, b1, out_features: int):
    """Plain-JAX f32 reference of the PyTorch forward (dropout p=0.0)."""
    h = jnp.maximum(jnp.einsum("bsf,fh->bsh", x, w1) + b1, 0.0)
    P = jnp.asarray(adaptive_avgpool_matrix(h.shape[-1], out_features))
    return jnp.einsum("bsh,ho->bso", h, P)


def mlp_reference_bf16(x, w1, b1, out_features: int):
    """Reference with the kernel's bf16 operand rounding (f32 accumulation, f32 pool)."""
    f32 = jnp.float32
    xb = x.astype(jnp.bfloat16).astype(f32)
    wb = w1.astype(jnp.bfloat16).astype(f32)
    h = jnp.maximum(jnp.einsum("bsf,fh->bsh", xb, wb) + b1.astype(f32), 0.0)
    P = jnp.asarray(adaptive_avgpool_matrix(h.shape[-1], out_features))
    return jnp.einsum("bsh,ho->bso", h, P)


if __name__ == "__main__":
    # Module config: in_features=16, hidden_size=32, out_features defaults to in_features.
    in_features, hidden_size = 16, 32
    out_features = in_features
    B, S = 2, 8

    key = jax.random.PRNGKey(0)
    kx, kw, kb = jax.random.split(key, 3)

    # Deterministic parameter init mimicking nn.Linear (uniform +/- 1/sqrt(in_features)).
    bound = 1.0 / np.sqrt(in_features)
    # Stored as (in_features, hidden) = transpose of torch's (hidden, in_features) weight.
    w1 = jax.random.uniform(kw, (in_features, hidden_size), jnp.float32, -bound, bound)
    b1 = jax.random.uniform(kb, (hidden_size,), jnp.float32, -bound, bound)
    x = jax.random.normal(kx, (B, S, in_features), jnp.float32)

    params = prepare_mlp_params(w1, b1, out_features)  # one-time weight prep
    out = jax.block_until_ready(mlp_forward(x, params))
    assert out.shape == (B, S, out_features)

    # Tight check against a reference with matching bf16 operand rounding.
    ref_bf16 = mlp_reference_bf16(x, w1, b1, out_features)
    np.testing.assert_allclose(np.asarray(out), np.asarray(ref_bf16), rtol=1e-2, atol=1e-2)

    # Semantics check against the exact f32 module math (tolerance covers bf16 rounding).
    ref_f32 = mlp_reference_f32(x, w1, b1, out_features)
    np.testing.assert_allclose(np.asarray(out), np.asarray(ref_f32), rtol=3e-2, atol=3e-2)

    print("KERNEL_OK")
</pallas_src>

<mosaic_0001>
module attributes {stable_mosaic.version = 11 : i64} {
  func.func @_mlp_kernel_resident(%arg0: i32, %arg1: memref<8x16xf32, #tpu.memory_space<vmem>>, %arg2: memref<16x32xbf16, #tpu.memory_space<vmem>>, %arg3: memref<1x32xf32, #tpu.memory_space<vmem>>, %arg4: memref<32x16xf32, #tpu.memory_space<vmem>>, %arg5: memref<8x16xf32, #tpu.memory_space<vmem>>) attributes {dimension_semantics = [#tpu.dimension_semantics<parallel>], iteration_bounds = array<i64: 2>, scalar_prefetch = 0 : i64, scratch_operands = 0 : i64, tpu.core_type = #tpu.core_type<tc>, window_params = [{transform_indices = @transform_0, window_bounds = array<i64: 8, 16>}, {pipeline_mode = #tpu.pipeline_mode<synchronous>, transform_indices = @transform_1, window_bounds = array<i64: 16, 32>}, {pipeline_mode = #tpu.pipeline_mode<synchronous>, transform_indices = @transform_2, window_bounds = array<i64: 1, 32>}, {pipeline_mode = #tpu.pipeline_mode<synchronous>, transform_indices = @transform_3, window_bounds = array<i64: 32, 16>}, {transform_indices = @transform_4, window_bounds = array<i64: 8, 16>}]} {
    %c0 = arith.constant 0 : index
    %c0_0 = arith.constant 0 : index
    %0 = vector.load %arg1[%c0, %c0_0] : memref<8x16xf32, #tpu.memory_space<vmem>>, vector<8x16xf32>
    %1 = arith.truncf %0 : vector<8x16xf32> to vector<8x16xbf16>
    %c0_1 = arith.constant 0 : index
    %c0_2 = arith.constant 0 : index
    %2 = vector.load %arg2[%c0_1, %c0_2] : memref<16x32xbf16, #tpu.memory_space<vmem>>, vector<16x32xbf16>
    %cst = arith.constant dense<0.000000e+00> : vector<8x32xf32>
    %3 = tpu.matmul %1, %2, %cst {dimension_numbers = #tpu.dot_dimension_numbers<[1], [0], [0], [1], [0, 0, 1, 1], [], []>} : vector<8x16xbf16>, vector<16x32xbf16>, vector<8x32xf32> -> vector<8x32xf32>
    %c0_3 = arith.constant 0 : index
    %c0_4 = arith.constant 0 : index
    %4 = vector.load %arg3[%c0_3, %c0_4] : memref<1x32xf32, #tpu.memory_space<vmem>>, vector<1x32xf32>
    %5 = vector.broadcast %4 : vector<1x32xf32> to vector<8x32xf32>
    %6 = arith.addf %3, %5 : vector<8x32xf32>
    %cst_5 = arith.constant 0.000000e+00 : f32
    %7 = vector.broadcast %cst_5 : f32 to vector<8x32xf32>
    %8 = arith.maximumf %6, %7 : vector<8x32xf32>
    %c0_6 = arith.constant 0 : index
    %c0_7 = arith.constant 0 : index
    %9 = vector.load %arg4[%c0_6, %c0_7] : memref<32x16xf32, #tpu.memory_space<vmem>>, vector<32x16xf32>
    %cst_8 = arith.constant dense<0.000000e+00> : vector<8x16xf32>
    %10 = tpu.matmul %8, %9, %cst_8 {dimension_numbers = #tpu.dot_dimension_numbers<[1], [0], [0], [1], [0, 0, 1, 1], [], []>} : vector<8x32xf32>, vector<32x16xf32>, vector<8x16xf32> -> vector<8x16xf32>
    %c0_9 = arith.constant 0 : index
    %c0_10 = arith.constant 0 : index
    %11 = vector.load %arg5[%c0_9, %c0_10] : memref<8x16xf32, #tpu.memory_space<vmem>>, vector<8x16xf32>
    tpu.vector_store %arg5[%c0_9, %c0_10], %10 {strides = array<i32>} : memref<8x16xf32, #tpu.memory_space<vmem>>, vector<8x16xf32>,
    return
  }
  func.func @transform_0(%arg0: i32) -> (i32, i32) {
    %c0_i32 = arith.constant 0 : i32
    %c0_i32_0 = arith.constant 0 : i32
    return %arg0, %c0_i32 : i32, i32
  }
  func.func @transform_1(%arg0: i32) -> (i32, i32) {
    %c0_i32 = arith.constant 0 : i32
    %c0_i32_0 = arith.constant 0 : i32
    %c0_i32_1 = arith.constant 0 : i32
    return %c0_i32, %c0_i32_0 : i32, i32
  }
  func.func @transform_2(%arg0: i32) -> (i32, i32) {
    %c0_i32 = arith.constant 0 : i32
    %c0_i32_0 = arith.constant 0 : i32
    %c0_i32_1 = arith.constant 0 : i32
    return %c0_i32, %c0_i32_0 : i32, i32
  }
  func.func @transform_3(%arg0: i32) -> (i32, i32) {
    %c0_i32 = arith.constant 0 : i32
    %c0_i32_0 = arith.constant 0 : i32
    %c0_i32_1 = arith.constant 0 : i32
    return %c0_i32, %c0_i32_0 : i32, i32
  }
  func.func @transform_4(%arg0: i32) -> (i32, i32) {
    %c0_i32 = arith.constant 0 : i32
    %c0_i32_0 = arith.constant 0 : i32
    return %arg0, %c0_i32 : i32, i32
  }
}

module attributes {stable_mosaic.version = 11 : i64} {
  func.func @_mlp_kernel_resident(%arg0: i32, %arg1: memref<8x16xf32, #tpu.memory_space<vmem>>, %arg2: memref<16x32xbf16, #tpu.memory_space<vmem>>, %arg3: memref<1x32xf32, #tpu.memory_space<vmem>>, %arg4: memref<32x16xf32, #tpu.memory_space<vmem>>, %arg5: memref<8x16xf32, #tpu.memory_space<vmem>>) attributes {dimension_semantics = [#tpu.dimension_semantics<parallel>], iteration_bounds = array<i64: 2>, scalar_prefetch = 0 : i64, scratch_operands = 0 : i64, tpu.core_type = #tpu.core_type<tc>, window_params = [{transform_indices = @transform_0, window_bounds = array<i64: 8, 16>}, {pipeline_mode = #tpu.pipeline_mode<synchronous>, transform_indices = @transform_1, window_bounds = array<i64: 16, 32>}, {pipeline_mode = #tpu.pipeline_mode<synchronous>, transform_indices = @transform_2, window_bounds = array<i64: 1, 32>}, {pipeline_mode = #tpu.pipeline_mode<synchronous>, transform_indices = @transform_3, window_bounds = array<i64: 32, 16>}, {transform_indices = @transform_4, window_bounds = array<i64: 8, 16>}]} {
    %c0 = arith.constant 0 : index
    %c0_0 = arith.constant 0 : index
    %0 = vector.load %arg1[%c0, %c0_0] : memref<8x16xf32, #tpu.memory_space<vmem>>, vector<8x16xf32>
    %1 = arith.truncf %0 : vector<8x16xf32> to vector<8x16xbf16>
    %c0_1 = arith.constant 0 : index
    %c0_2 = arith.constant 0 : index
    %2 = vector.load %arg2[%c0_1, %c0_2] : memref<16x32xbf16, #tpu.memory_space<vmem>>, vector<16x32xbf16>
    %cst = arith.constant dense<0.000000e+00> : vector<8x32xf32>
    %3 = tpu.matmul %1, %2, %cst {dimension_numbers = #tpu.dot_dimension_numbers<[1], [0], [0], [1], [0, 0, 1, 1], [], []>} : vector<8x16xbf16>, vector<16x32xbf16>, vector<8x32xf32> -> vector<8x32xf32>
    %c0_3 = arith.constant 0 : index
    %c0_4 = arith.constant 0 : index
    %4 = vector.load %arg3[%c0_3, %c0_4] : memref<1x32xf32, #tpu.memory_space<vmem>>, vector<1x32xf32>
    %5 = vector.broadcast %4 : vector<1x32xf32> to vector<8x32xf32>
    %6 = arith.addf %3, %5 : vector<8x32xf32>
    %cst_5 = arith.constant 0.000000e+00 : f32
    %7 = vector.broadcast %cst_5 : f32 to vector<8x32xf32>
    %8 = arith.maximumf %6, %7 : vector<8x32xf32>
    %c0_6 = arith.constant 0 : index
    %c0_7 = arith.constant 0 : index
    %9 = vector.load %arg4[%c0_6, %c0_7] : memref<32x16xf32, #tpu.memory_space<vmem>>, vector<32x16xf32>
    %cst_8 = arith.constant dense<0.000000e+00> : vector<8x16xf32>
    %10 = tpu.matmul %8, %9, %cst_8 {dimension_numbers = #tpu.dot_dimension_numbers<[1], [0], [0], [1], [0, 0, 1, 1], [], []>} : vector<8x32xf32>, vector<32x16xf32>, vector<8x16xf32> -> vector<8x16xf32>
    %c0_9 = arith.constant 0 : index
    %c0_10 = arith.constant 0 : index
    %11 = vector.load %arg5[%c0_9, %c0_10] : memref<8x16xf32, #tpu.memory_space<vmem>>, vector<8x16xf32>
    tpu.vector_store %arg5[%c0_9, %c0_10], %10 {strides = array<i32>} : memref<8x16xf32, #tpu.memory_space<vmem>>, vector<8x16xf32>,
    return
  }
  func.func @transform_0(%arg0: i32) -> (i32, i32) {
    %c0_i32 = arith.constant 0 : i32
    %c0_i32_0 = arith.constant 0 : i32
    return %arg0, %c0_i32 : i32, i32
  }
  func.func @transform_1(%arg0: i32) -> (i32, i32) {
    %c0_i32 = arith.constant 0 : i32
    %c0_i32_0 = arith.constant 0 : i32
    %c0_i32_1 = arith.constant 0 : i32
    return %c0_i32, %c0_i32_0 : i32, i32
  }
  func.func @transform_2(%arg0: i32) -> (i32, i32) {
    %c0_i32 = arith.constant 0 : i32
    %c0_i32_0 = arith.constant 0 : i32
    %c0_i32_1 = arith.constant 0 : i32
    return %c0_i32, %c0_i32_0 : i32, i32
  }
  func.func @transform_3(%arg0: i32) -> (i32, i32) {
    %c0_i32 = arith.constant 0 : i32
    %c0_i32_0 = arith.constant 0 : i32
    %c0_i32_1 = arith.constant 0 : i32
    return %c0_i32, %c0_i32_0 : i32, i32
  }
  func.func @transform_4(%arg0: i32) -> (i32, i32) {
    %c0_i32 = arith.constant 0 : i32
    %c0_i32_0 = arith.constant 0 : i32
    return %arg0, %c0_i32 : i32, i32
  }
}

</mosaic_0001>

<bundles_post_ra>
// kernel: tpu_custom_call.1
= control target key start
LH: loop header
LB: loop body
LE: loop exit
PB: predicated region body
PF: predicated region fallthrough
CT: control target
= control target key end

     0   :  { %9 = vsyncpa [#allocation3], 0  ;;  %s1135_s0 = inlined_call_operand.hbm [shape: f32[16,16], index: 0, kind: input, shape index: {}]   ;;  %s1136_s1 = inlined_call_operand.hbm [shape: bf16[16,32], index: 1, kind: input, shape index: {}]   ;;  %s1137_s2 = inlined_call_operand.hbm [shape: f32[1,32], index: 2, kind: input, shape index: {}]   ;;  %s1138_s3 = inlined_call_operand.hbm [shape: f32[32,16], index: 3, kind: input, shape index: {}]   ;;  %s1139_s4 = inlined_call_operand.hbm [shape: f32[16,16], index: 4, kind: output, shape index: {}]  }
   0x1   :  { %11 = vsyncpa [#allocation3 + $0x1], 0 }
   0x2   :  { %12 = vsyncpa [#allocation6], 0 }
   0x3   :  { %13 = vsyncpa [#allocation9], 0 }
   0x4   :  { %14 = vsyncpa [#allocation4], 0 }
   0x5   :  { %16 = vsyncpa [#allocation4 + $0x1], 0  ;;  %s874_s15 = smov 0   ;;  %s876_s16 = smov 0  }
   0x6   :  { %s878_s17 = smov 0   ;;  %s880_s18 = smov 0  }
   0x7 LB: > { %s895_s19 = sadd.s32 4294967295, %s835_s18   ;;  %s510_s20 = sadd.s32 4294967294, %s835_s18   ;;  %s835_s18 = sphi %s880_s18, %s1162_s18   ;;  %s831_s17 = sphi %s878_s17, %s1161_s17   ;;  %s827_s16 = sphi %s876_s16, %s1160_s16   ;;  %s823_s15 = sphi %s874_s15, %s1159_s15  }
   0x8   : > { %p42_p0 = scmp.ne.s32.totalorder %s827_s16, %s823_s15  ;;  %p1140_p1 = scmp.eq.s32.totalorder %s895_s19, 0 }
   0x9   : > { %p135_p3 = scmp.eq.s32.totalorder %s510_s20, 1  ;;  %p511_p5 = scmp.ge.s32.totalorder %s835_s18, 1 }
   0xa   : > { %p904_p4 = por %p1140_p1, %p42_p0  ;;  %p142_p7 = scmp.lt.s32.totalorder %s835_s18, 3 }
   0xb   : > { %p909_p6 = por %p135_p3, %p42_p0  ;;  %s837_s24 = smov [#allocation5]  }
   0xc   : > { %s1143_s21 = scalar_select %p904_p4, 1, 0 }
   0xd   : > { %s1144_s22 = scalar_select %p909_p6, 1, 0 }
   0xe   : > { %p914_p8 = pnand %p511_p5, %p142_p7  ;;  %s154_s25 = sshll.u32 %s837_s24, 4  ;;  %s918_s25 = int_to_ptr.vmem [resolvable:$true] %s154_s25 }
   0xf   : > { %s838_s27 = smov [#allocation7]   ;;  %s839_s29 = smov [#allocation8]  }
  0x10   : > { %s1145_s23 = scalar_select %p914_p8, 1, 0 }
  0x11   : > { %p578_p9 = pneg %p914_p8  ;;  %s168_s28 = sshll.u32 %s838_s27, 4  ;;  %s929_s28 = int_to_ptr.vmem [resolvable:$true] %s168_s28 }
  0x12   : > { %s931_s30 = sshll.u32 %s839_s29, 4  ;;  %s647_s7 = scalar_lea.hbm %s1136_s1, 128  ;;  %s179_s30 = int_to_ptr.vmem [resolvable:$true] %s931_s30 }
  0x13   : > { %p925_p11 = pnand %p578_p9, %p1140_p1  ;;  %p648_p12 = scmp.ne.s32.totalorder %s1136_s1, %s647_s7 }
  0x14   : > { %p654_p5 = scmp.lt.u32.totalorder %s647_s7, %s1136_s1 }
  0x15   : > { %p941_p13 = pneg %p925_p11 }
  0x17   : > { %p650_p0 = pnand %p941_p13, %p648_p12 }
  0x19   : > { %p651_p3 = pneg %p650_p0 }
  0x1b   : > { %p656_p7 = pnand %p654_p5, %p651_p3 }
  0x1d   : > { %659 = shalt.err (!%p656_p7)
}
  0x1e   : > { %s660_s13 = scalar_lea.vmem %s918_s25, 128  ;;  %p668_p2 = scmp.lt.s32.totalorder %s918_s25, %s918_s25 }
  0x1f   : > { %p661_p9 = scmp.ne.s32.totalorder %s918_s25, %s660_s13  ;;  %p669_p6 = scmp.lt.s32.totalorder %s660_s13, %s660_s13 }
  0x21   : > { %p663_p10 = pnand %p661_p9, %p941_p13  ;;  %p670_p12 = por %p669_p6, %p668_p2 }
  0x23   : > { %p664_p1 = pneg %p663_p10 }
  0x25   : > { %p671_p0 = pnand %p670_p12, %p664_p1 }
  0x27   : > { %674 = shalt.err (!%p671_p0)
}
  0x28   : > { %s840_s14 = smov 64   ;;  %s841_s20 = smov 4  }
  0x29   : > { %581 = dma.hbm_to_vmem [thread:$0]  (!%p925_p11), %s1136_s1, 128, %s918_s25, [#allocation6], %s840_s14, %s840_s14, %s841_s20  }
  0x2a   : > { %s675_s6 = scalar_lea.hbm %s1137_s2, 16 }
  0x2b   : > { %p676_p2 = scmp.ne.s32.totalorder %s1137_s2, %s675_s6  ;;  %p682_p10 = scmp.lt.u32.totalorder %s675_s6, %s1137_s2 }
  0x2d   : > { %p678_p1 = pnand %p676_p2, %p941_p13 }
  0x2f   : > { %p679_p6 = pneg %p678_p1 }
  0x31   : > { %p684_p3 = pnand %p682_p10, %p679_p6 }
  0x33   : > { %687 = shalt.err (!%p684_p3)
}
  0x34   : > { %s688_s25 = scalar_lea.vmem %s929_s28, 16  ;;  %s695_s12 = scalar_lea.vmem %s929_s28, 32 }
  0x35   : > { %p689_p5 = scmp.ne.s32.totalorder %s929_s28, %s688_s25  ;;  %p696_p12 = scmp.lt.s32.totalorder %s929_s28, %s929_s28 }
  0x36   : > { %p697_p0 = scmp.lt.s32.totalorder %s695_s12, %s688_s25 }
  0x37   : > { %p691_p7 = pnand %p689_p5, %p941_p13 }
  0x38   : > { %p698_p2 = por %p697_p0, %p696_p12 }
  0x39   : > { %p692_p9 = pneg %p691_p7 }
  0x3b   : > { %p699_p1 = pnand %p698_p2, %p692_p9 }
  0x3d   : > { %702 = shalt.err (!%p699_p1)
}
  0x3e   : > { %584 = dma.hbm_to_vmem [thread:$0]  (!%p925_p11), %s1137_s2, 16, %s929_s28, [#allocation6]  }
  0x3f   : > { %s703_s27 = scalar_lea.hbm %s1138_s3, 512 }
  0x40   : > { %p704_p6 = scmp.ne.s32.totalorder %s1138_s3, %s703_s27  ;;  %p710_p5 = scmp.lt.u32.totalorder %s703_s27, %s1138_s3 }
  0x42   : > { %p706_p10 = pnand %p704_p6, %p941_p13 }
  0x44   : > { %p707_p3 = pneg %p706_p10 }
  0x46   : > { %p712_p7 = pnand %p710_p5, %p707_p3 }
  0x48   : > { %715 = shalt.err (!%p712_p7)
}
  0x49   : > { %s716_s8 = scalar_lea.vmem %s179_s30, 512  ;;  %p724_p2 = scmp.lt.s32.totalorder %s179_s30, %s179_s30 }
  0x4a   : > { %p717_p9 = scmp.ne.s32.totalorder %s179_s30, %s716_s8  ;;  %p725_p1 = scmp.lt.s32.totalorder %s716_s8, %s716_s8 }
  0x4c   : > { %p719_p12 = pnand %p717_p9, %p941_p13  ;;  %p726_p4 = por %p725_p1, %p724_p2 }
  0x4e   : > { %p720_p0 = pneg %p719_p12 }
  0x50   : > { %p727_p8 = pnand %p726_p4, %p720_p0 }
  0x52   : > { %730 = shalt.err (!%p727_p8)
}
  0x53   : > { %s842_s28 = smov 128   ;;  %s843_s10 = smov 8  }
  0x54   : > { %587 = dma.hbm_to_vmem [thread:$0]  (!%p925_p11), %s1138_s3, 512, %s179_s30, [#allocation9], %s842_s28, %s842_s28, %s843_s10  }
  0x55   : > { %s1006_s25 = sadd.s32 1, %s835_s18   ;;  %s29_s13 = sadd.s32 1, %s831_s17 }
  0x56   : > { %s26_s12 = ssub.s32 %s835_s18, %s1006_s25  ;;  %p36_p8 = scmp.ne.s32.totalorder %s831_s17, %s827_s16 }
  0x57   : > { %p27_p4 = scmp.eq.s32.totalorder %s26_s12, 0  ;;  %p37_p13 = scmp.eq.s32.totalorder %s835_s18, 0 }
  0x58   : > { %p599_p6 = scmp.lt.s32.totalorder %s835_s18, 2  ;;  %p1148_p3 = scmp.eq.s32.totalorder %s895_s19, 1 }
  0x59   : > { %s1016_s14 = scalar_select %p27_p4, %s831_s17, %s29_s13  }
  0x5a   : > { %p38_p10 = por %p37_p13, %p36_p8  ;;  %p1020_p5 = por %p1148_p3, %p36_p8 }
  0x5b   : > { %s192_s26 = sand.u32 1, %s831_s17   ;;  %s517_s24 = sshll.u32 %s835_s18, 7 }
  0x5c   : > { %s516_s30 = sshll.u32 %s192_s26, 3  ;;  %s1029_s5 = scalar_lea.hbm %s1135_s0, %s517_s24 }
  0x5d   : > { %s196_s6 = scalar_lea.vmem [#allocation2], %s516_s30  ;;  %p1031_p11 = pnand %p599_p6, %p38_p10 }
  0x5e   : > { %s203_s7 = sshll.u32 %s196_s6, 4  ;;  %s193_s28 = scalar_lea.sflag [#allocation3], %s192_s26  ;;  %s1035_s7 = int_to_ptr.vmem [resolvable:$true] %s203_s7 }
  0x5f   : > { %s731_s10 = scalar_lea.hbm %s1029_s5, 128  ;;  %p733_p9 = pneg %p1031_p11 }
  0x60   : > { %p732_p7 = scmp.ne.s32.totalorder %s1029_s5, %s731_s10  ;;  %s736_s12 = scalar_lea.hbm %s1135_s0, 256 }
  0x61   : > { %p737_p2 = scmp.lt.u32.totalorder %s1029_s5, %s1135_s0  ;;  %p738_p1 = scmp.lt.u32.totalorder %s736_s12, %s731_s10 }
  0x62   : > { %p734_p12 = pnand %p733_p9, %p732_p7  ;;  %p740_p8 = scmp.lt.u32.totalorder %s731_s10, %s1029_s5 }
  0x63   : > { %p739_p4 = por %p738_p1, %p737_p2 }
  0x64   : > { %p735_p0 = pneg %p734_p12 }
  0x65   : > { %p741_p13 = por %p740_p8, %p739_p4 }
  0x67   : > { %p742_p6 = pnand %p741_p13, %p735_p0 }
  0x69   : > { %745 = shalt.err (!%p742_p6)
}
  0x6a   : > { %s746_s26 = scalar_lea.vmem %s1035_s7, 128  ;;  %s844_s30 = smov [#allocation2]  }
  0x6b   : > { %p747_p10 = scmp.ne.s32.totalorder %s1035_s7, %s746_s26  ;;  %s751_s27 = sshll.u32 %s844_s30, 4  ;;  %s752_s27 = int_to_ptr.vmem [resolvable:$false] %s751_s27 }
  0x6c   : > { %s753_s29 = scalar_lea.vmem %s752_s27, 256  ;;  %p754_p12 = scmp.lt.s32.totalorder %s1035_s7, %s752_s27 }
  0x6d   : > { %p749_p3 = pnand %p747_p10, %p733_p9  ;;  %p755_p2 = scmp.lt.s32.totalorder %s753_s29, %s746_s26 }
  0x6f   : > { %p750_p7 = pneg %p749_p3  ;;  %p756_p1 = por %p755_p2, %p754_p12 }
  0x71   : > { %p757_p4 = pnand %p756_p1, %p750_p7 }
  0x73   : > { %760 = shalt.err (!%p757_p4)
}
  0x74   : > { %591 = dma.hbm_to_vmem [thread:$0]  (!%p1031_p11), %s1029_s5, 128, %s1035_s7, %s193_s28  }
  0x75   : > { %p1151_p0 = scmp.ne.s32.totalorder %s1145_s23, 0 }
  0x76   : > { %s1065_s6 = sand.u32 (!%p1151_p0), 1, %s827_s16   ;;  %p1152_p9 = scmp.ne.s32.totalorder (!%p1151_p0), %s1143_s21, 0 }
  0x77   : > { %212 = sbr.rel (%p1151_p0) target bundleno = 582 (0x246), region = 36  ;;  %s519_s10 = sshll.u32 (!%p1151_p0), %s1065_s6, 3 }
  0x78   : > { %s215_s9 = scalar_lea.sflag (!%p1151_p0), [#allocation3], %s1065_s6  ;;  %s218_s11 = scalar_lea.vmem (!%p1151_p0), [#allocation2], %s519_s10 }
  0x7e   : > { %806 = dma.done.wait (%p1152_p9), %s215_s9, 128  }
  0x7f   : > { %808 = vsyncadd (%p1152_p9), %s215_s9, 4294967168  ;;  %p1153_p11 = scmp.eq.s32.totalorder %s895_s19, 0 }
  0x81   : > { %810 = dma.done.wait (%p1153_p11), [#allocation6], 144   ;;  %p1154_p8 = pmov %p1153_p11 }
  0x83   : > { %812 = vsyncadd (%p1154_p8), [#allocation6], 4294967152  ;;  %p1155_p13 = pmov %p1154_p8 }
  0x84   : > { %p1156_p6 = pmov %p1154_p8 }
  0x85   : > { %814 = dma.done.wait (%p1155_p13), [#allocation9], 512  }
  0x86   : > { %816 = vsyncadd (%p1156_p6), [#allocation9], 4294966784  ;;  %v845_v0 = vmov 0.0   ;;  %vm846_vm0 = vmmov 0   ;;  %v847_v1 = vmov 0.0|0.0   ;;  %v646_v2 = vld [vmem:[#allocation5] sm:$0xff]  }
  0x87   : > { %539 = vmatprep.subr.bf16.mxu0 %v845_v0  ;;  %541 = vmatprep.mubr.msk.bf16.mxu0 %vm846_vm0, %v845_v0  ;;  %v256_v3 = vld [vmem:[%s218_s11] sm:$0xff]  ;;  %vm273_vm1 = vcmask 130048   ;;  %v321_v9 = vld [vmem:[#allocation8 + $0x18] sm:$0xff]  ;;  %vm322_vm2 = vcmask 261120   ;;  %s529_s21 = sshll.u32 %s895_s19, 7  ;;  %s254_s23 = scalar_lea.vmem [#allocation10], %s519_s10 }
  0x88   : > { %556 = vmatprep.subr.bf16.mxu1 %v847_v1  ;;  %553 = vmatprep.mubr.msk.f32.mxu1 %vm846_vm0, %v845_v0  ;;  %v318_v4 = vld [vmem:[#allocation8] sm:$0xff]  ;;  %v319_v5 = vld [vmem:[#allocation8 + $0x8] sm:$0xff]  ;;  %v257_v6 = vpack.c.bf16 %v256_v3, %v256_v3  ;;  %v320_v8 = vld [vmem:[#allocation8 + $0x10] sm:$0xff]  ;;  %s411_s5 = sshll.u32 %s254_s23, 4  ;;  %s1090_s28 = scalar_lea.hbm %s1139_s4, %s529_s21  ;;  %s1092_s5 = int_to_ptr.vmem [resolvable:$true] %s411_s5 }
  0x89   : > { %540 = vmatpush3.bf16.msra.mxu0 %v646_v2  ;;  %v557_v7 = vpack.c.bf16 %v319_v5, %v318_v4  ;;  %v560_v10 = vpack.c.bf16 %v321_v9, %v320_v8  ;;  %v524_v11 = vld [vmem:[#allocation7] ss:$0 sm:$0xff]  ;;  %s398_s12 = scalar_lea.sflag [#allocation4], %s1065_s6  ;;  %s761_s13 = scalar_lea.vmem %s1092_s5, 128 }
  0x8a   : > { %p762_p10 = scmp.ne.s32.totalorder %s1092_s5, %s761_s13  ;;  %s848_s19 = smov [#allocation10]  }
  0x8b   : > { %558 = vmatpush3.bf16.msra.mxu1 %v557_v7  ;;  %s765_s24 = sshll.u32 %s848_s19, 4  ;;  %s766_s24 = int_to_ptr.vmem [resolvable:$false] %s765_s24 }
  0x8c   : > { %542 = vmatmul.mubr.msk.bf16.vlgmr.msra.gmra.mrb[0].mxu0 %vm273_vm1, %v257_v6  ;;  %559 = vmatprep.subr.bf16.mxu1 %v847_v1  ;;  %p763_p3 = pnand %p762_p10, %p1020_p5  ;;  %s767_s26 = scalar_lea.vmem %s766_s24, 256 }
  0x8d   : > { %p768_p12 = scmp.lt.s32.totalorder %s1092_s5, %s766_s24  ;;  %p769_p2 = scmp.lt.s32.totalorder %s767_s26, %s761_s13 }
  0x8e   : > { %p764_p7 = pneg %p763_p3 }
  0x8f   : > { %561 = vmatpush3.bf16.msra.mxu1 %v560_v10  ;;  %p770_p1 = por %p769_p2, %p768_p12 }
  0x91   : > { %p771_p4 = pnand %p770_p1, %p764_p7 }
 0x15f   : > { %v311_v12 = vpop.f32.mrb[0].mxu0 }
 0x160   : > { %v312_v13 = vadd.f32 %v524_v11, %v311_v12  ;;  %v543_v14 = vpop.f32.mrb[1].mxu0 }
 0x161   : > { %v314_v15 = vpop.f32.mrb[2].mxu0 }
 0x162   : > { %v317_v16 = vmax.f32 %v312_v13, 0.0  ;;  %v544_v17 = vpop.f32.mrb[3].mxu0 }
 0x164   : > { %554 = vmatmul.mubr.msk.f32.vlgmr.msra.gmra.mrb[0].mxu1 %vm322_vm2, %v317_v16 }
 0x237   : > { %v392_v18 = vpop.f32.mrb[0].mxu1 }
 0x238   : > { %396 = vst.msk [vmem:[%s254_s23] sm:$0xff] %vm273_vm1, %v392_v18  ;;  %v555_v19 = vpop.f32.mrb[1].mxu1 }
 0x239   : > { %774 = shalt.err (!%p771_p4)
}
 0x23a   : > { %s775_s30 = scalar_lea.hbm %s1090_s28, 128  ;;  %s779_s6 = scalar_lea.hbm %s1139_s4, 256 }
 0x23b   : > { %p776_p0 = scmp.ne.s32.totalorder %s1090_s28, %s775_s30  ;;  %p780_p8 = scmp.lt.u32.totalorder %s1090_s28, %s1139_s4 }
 0x23c   : > { %p781_p13 = scmp.lt.u32.totalorder %s779_s6, %s775_s30  ;;  %p783_p10 = scmp.lt.u32.totalorder %s775_s30, %s1090_s28 }
 0x23d   : > { %p777_p9 = pnand %p776_p0, %p1020_p5 }
 0x23e   : > { %p782_p6 = por %p781_p13, %p780_p8 }
 0x23f   : > { %p778_p11 = pneg %p777_p9 }
 0x240   : > { %p784_p3 = por %p783_p10, %p782_p6 }
 0x242   : > { %p785_p7 = pnand %p784_p3, %p778_p11 }
 0x244   : > { %788 = shalt.err (!%p785_p7)
}
 0x245   : > { %576 = dma.vmem_to_hbm [thread:$0]  (%p1020_p5), %s1092_s5, 128, %s1090_s28, %s398_s12  }
 0x246 PF: > { %s423_s11 = sand.u32 1, %s823_s15   ;;  %p1157_p12 = scmp.ne.s32.totalorder %s1144_s22, 0 }
 0x247   : > { %p1158_p2 = scmp.ge.s32.totalorder %s835_s18, 2  ;;  %s424_s21 = scalar_lea.sflag [#allocation4], %s423_s11 }
 0x249   : > { %p593_p1 = pnand %p1158_p2, %p1157_p12 }
 0x24b   : > { %818 = dma.done.wait (!%p593_p1), %s424_s21, 128  }
 0x24c   : > { %820 = vsyncadd (!%p593_p1), %s424_s21, 4294967168  ;;  %p19_p4 = scmp.ge.s32.totalorder %s1006_s25, 4   ;;  %s1159_s15 = smov %s827_s16 }
 0x24d   : > { %s1160_s16 = smov %s831_s17  ;;  %s1161_s17 = smov %s1016_s14 }
 0x24e   : > { %s1162_s18 = smov %s1006_s25  ;;  %21 = sbr.rel (!%p19_p4) target bundleno = 7 (0x7), region = 93 }
 0x255   :  { %429 = vsyncpa [#allocation3], 1 }
 0x256   :  { %431 = vsyncpa [#allocation3 + $0x1], 1 }
 0x257   :  { %432 = vsyncpa [#allocation6], 1 }
 0x258   :  { %433 = vsyncpa [#allocation9], 1 }
 0x259   :  { %434 = vsyncpa [#allocation4], 1 }
 0x25a   :  { %436 = vsyncpa [#allocation4 + $0x1], 1 }

// kernel: tpu_custom_call.1
= control target key start
LH: loop header
LB: loop body
LE: loop exit
PB: predicated region body
PF: predicated region fallthrough
CT: control target
= control target key end

     0   :  { %9 = vsyncpa [#allocation3], 0  ;;  %s1135_s0 = inlined_call_operand.hbm [shape: f32[16,16], index: 0, kind: input, shape index: {}]   ;;  %s1136_s1 = inlined_call_operand.hbm [shape: bf16[16,32], index: 1, kind: input, shape index: {}]   ;;  %s1137_s2 = inlined_call_operand.hbm [shape: f32[1,32], index: 2, kind: input, shape index: {}]   ;;  %s1138_s3 = inlined_call_operand.hbm [shape: f32[32,16], index: 3, kind: input, shape index: {}]   ;;  %s1139_s4 = inlined_call_operand.hbm [shape: f32[16,16], index: 4, kind: output, shape index: {}]  }
   0x1   :  { %11 = vsyncpa [#allocation3 + $0x1], 0 }
   0x2   :  { %12 = vsyncpa [#allocation6], 0 }
   0x3   :  { %13 = vsyncpa [#allocation9], 0 }
   0x4   :  { %14 = vsyncpa [#allocation4], 0 }
   0x5   :  { %16 = vsyncpa [#allocation4 + $0x1], 0  ;;  %s874_s15 = smov 0   ;;  %s876_s16 = smov 0  }
   0x6   :  { %s878_s17 = smov 0   ;;  %s880_s18 = smov 0  }
   0x7 LB: > { %s895_s19 = sadd.s32 4294967295, %s835_s18   ;;  %s510_s20 = sadd.s32 4294967294, %s835_s18   ;;  %s835_s18 = sphi %s880_s18, %s1162_s18   ;;  %s831_s17 = sphi %s878_s17, %s1161_s17   ;;  %s827_s16 = sphi %s876_s16, %s1160_s16   ;;  %s823_s15 = sphi %s874_s15, %s1159_s15  }
   0x8   : > { %p42_p0 = scmp.ne.s32.totalorder %s827_s16, %s823_s15  ;;  %p1140_p1 = scmp.eq.s32.totalorder %s895_s19, 0 }
   0x9   : > { %p135_p3 = scmp.eq.s32.totalorder %s510_s20, 1  ;;  %p511_p5 = scmp.ge.s32.totalorder %s835_s18, 1 }
   0xa   : > { %p904_p4 = por %p1140_p1, %p42_p0  ;;  %p142_p7 = scmp.lt.s32.totalorder %s835_s18, 3 }
   0xb   : > { %p909_p6 = por %p135_p3, %p42_p0  ;;  %s837_s24 = smov [#allocation5]  }
   0xc   : > { %s1143_s21 = scalar_select %p904_p4, 1, 0 }
   0xd   : > { %s1144_s22 = scalar_select %p909_p6, 1, 0 }
   0xe   : > { %p914_p8 = pnand %p511_p5, %p142_p7  ;;  %s154_s25 = sshll.u32 %s837_s24, 4  ;;  %s918_s25 = int_to_ptr.vmem [resolvable:$true] %s154_s25 }
   0xf   : > { %s838_s27 = smov [#allocation7]   ;;  %s839_s29 = smov [#allocation8]  }
  0x10   : > { %s1145_s23 = scalar_select %p914_p8, 1, 0 }
  0x11   : > { %p578_p9 = pneg %p914_p8  ;;  %s168_s28 = sshll.u32 %s838_s27, 4  ;;  %s929_s28 = int_to_ptr.vmem [resolvable:$true] %s168_s28 }
  0x12   : > { %s931_s30 = sshll.u32 %s839_s29, 4  ;;  %s647_s7 = scalar_lea.hbm %s1136_s1, 128  ;;  %s179_s30 = int_to_ptr.vmem [resolvable:$true] %s931_s30 }
  0x13   : > { %p925_p11 = pnand %p578_p9, %p1140_p1  ;;  %p648_p12 = scmp.ne.s32.totalorder %s1136_s1, %s647_s7 }
  0x14   : > { %p654_p5 = scmp.lt.u32.totalorder %s647_s7, %s1136_s1 }
  0x15   : > { %p941_p13 = pneg %p925_p11 }
  0x17   : > { %p650_p0 = pnand %p941_p13, %p648_p12 }
  0x19   : > { %p651_p3 = pneg %p650_p0 }
  0x1b   : > { %p656_p7 = pnand %p654_p5, %p651_p3 }
  0x1d   : > { %659 = shalt.err (!%p656_p7)
}
  0x1e   : > { %s660_s13 = scalar_lea.vmem %s918_s25, 128  ;;  %p668_p2 = scmp.lt.s32.totalorder %s918_s25, %s918_s25 }
  0x1f   : > { %p661_p9 = scmp.ne.s32.totalorder %s918_s25, %s660_s13  ;;  %p669_p6 = scmp.lt.s32.totalorder %s660_s13, %s660_s13 }
  0x21   : > { %p663_p10 = pnand %p661_p9, %p941_p13  ;;  %p670_p12 = por %p669_p6, %p668_p2 }
  0x23   : > { %p664_p1 = pneg %p663_p10 }
  0x25   : > { %p671_p0 = pnand %p670_p12, %p664_p1 }
  0x27   : > { %674 = shalt.err (!%p671_p0)
}
  0x28   : > { %s840_s14 = smov 64   ;;  %s841_s20 = smov 4  }
  0x29   : > { %581 = dma.hbm_to_vmem [thread:$0]  (!%p925_p11), %s1136_s1, 128, %s918_s25, [#allocation6], %s840_s14, %s840_s14, %s841_s20  }
  0x2a   : > { %s675_s6 = scalar_lea.hbm %s1137_s2, 16 }
  0x2b   : > { %p676_p2 = scmp.ne.s32.totalorder %s1137_s2, %s675_s6  ;;  %p682_p10 = scmp.lt.u32.totalorder %s675_s6, %s1137_s2 }
  0x2d   : > { %p678_p1 = pnand %p676_p2, %p941_p13 }
  0x2f   : > { %p679_p6 = pneg %p678_p1 }
  0x31   : > { %p684_p3 = pnand %p682_p10, %p679_p6 }
  0x33   : > { %687 = shalt.err (!%p684_p3)
}
  0x34   : > { %s688_s25 = scalar_lea.vmem %s929_s28, 16  ;;  %s695_s12 = scalar_lea.vmem %s929_s28, 32 }
  0x35   : > { %p689_p5 = scmp.ne.s32.totalorder %s929_s28, %s688_s25  ;;  %p696_p12 = scmp.lt.s32.totalorder %s929_s28, %s929_s28 }
  0x36   : > { %p697_p0 = scmp.lt.s32.totalorder %s695_s12, %s688_s25 }
  0x37   : > { %p691_p7 = pnand %p689_p5, %p941_p13 }
  0x38   : > { %p698_p2 = por %p697_p0, %p696_p12 }
  0x39   : > { %p692_p9 = pneg %p691_p7 }
  0x3b   : > { %p699_p1 = pnand %p698_p2, %p692_p9 }
  0x3d   : > { %702 = shalt.err (!%p699_p1)
}
  0x3e   : > { %584 = dma.hbm_to_vmem [thread:$0]  (!%p925_p11), %s1137_s2, 16, %s929_s28, [#allocation6]  }
  0x3f   : > { %s703_s27 = scalar_lea.hbm %s1138_s3, 512 }
  0x40   : > { %p704_p6 = scmp.ne.s32.totalorder %s1138_s3, %s703_s27  ;;  %p710_p5 = scmp.lt.u32.totalorder %s703_s27, %s1138_s3 }
  0x42   : > { %p706_p10 = pnand %p704_p6, %p941_p13 }
  0x44   : > { %p707_p3 = pneg %p706_p10 }
  0x46   : > { %p712_p7 = pnand %p710_p5, %p707_p3 }
  0x48   : > { %715 = shalt.err (!%p712_p7)
}
  0x49   : > { %s716_s8 = scalar_lea.vmem %s179_s30, 512  ;;  %p724_p2 = scmp.lt.s32.totalorder %s179_s30, %s179_s30 }
  0x4a   : > { %p717_p9 = scmp.ne.s32.totalorder %s179_s30, %s716_s8  ;;  %p725_p1 = scmp.lt.s32.totalorder %s716_s8, %s716_s8 }
  0x4c   : > { %p719_p12 = pnand %p717_p9, %p941_p13  ;;  %p726_p4 = por %p725_p1, %p724_p2 }
  0x4e   : > { %p720_p0 = pneg %p719_p12 }
  0x50   : > { %p727_p8 = pnand %p726_p4, %p720_p0 }
  0x52   : > { %730 = shalt.err (!%p727_p8)
}
  0x53   : > { %s842_s28 = smov 128   ;;  %s843_s10 = smov 8  }
  0x54   : > { %587 = dma.hbm_to_vmem [thread:$0]  (!%p925_p11), %s1138_s3, 512, %s179_s30, [#allocation9], %s842_s28, %s842_s28, %s843_s10  }
  0x55   : > { %s1006_s25 = sadd.s32 1, %s835_s18   ;;  %s29_s13 = sadd.s32 1, %s831_s17 }
  0x56   : > { %s26_s12 = ssub.s32 %s835_s18, %s1006_s25  ;;  %p36_p8 = scmp.ne.s32.totalorder %s831_s17, %s827_s16 }
  0x57   : > { %p27_p4 = scmp.eq.s32.totalorder %s26_s12, 0  ;;  %p37_p13 = scmp.eq.s32.totalorder %s835_s18, 0 }
  0x58   : > { %p599_p6 = scmp.lt.s32.totalorder %s835_s18, 2  ;;  %p1148_p3 = scmp.eq.s32.totalorder %s895_s19, 1 }
  0x59   : > { %s1016_s14 = scalar_select %p27_p4, %s831_s17, %s29_s13  }
  0x5a   : > { %p38_p10 = por %p37_p13, %p36_p8  ;;  %p1020_p5 = por %p1148_p3, %p36_p8 }
  0x5b   : > { %s192_s26 = sand.u32 1, %s831_s17   ;;  %s517_s24 = sshll.u32 %s835_s18, 7 }
  0x5c   : > { %s516_s30 = sshll.u32 %s192_s26, 3  ;;  %s1029_s5 = scalar_lea.hbm %s1135_s0, %s517_s24 }
  0x5d   : > { %s196_s6 = scalar_lea.vmem [#allocation2], %s516_s30  ;;  %p1031_p11 = pnand %p599_p6, %p38_p10 }
  0x5e   : > { %s203_s7 = sshll.u32 %s196_s6, 4  ;;  %s193_s28 = scalar_lea.sflag [#allocation3], %s192_s26  ;;  %s1035_s7 = int_to_ptr.vmem [resolvable:$true] %s203_s7 }
  0x5f   : > { %s731_s10 = scalar_lea.hbm %s1029_s5, 128  ;;  %p733_p9 = pneg %p1031_p11 }
  0x60   : > { %p732_p7 = scmp.ne.s32.totalorder %s1029_s5, %s731_s10  ;;  %s736_s12 = scalar_lea.hbm %s1135_s0, 256 }
  0x61   : > { %p737_p2 = scmp.lt.u32.totalorder %s1029_s5, %s1135_s0  ;;  %p738_p1 = scmp.lt.u32.totalorder %s736_s12, %s731_s10 }
  0x62   : > { %p734_p12 = pnand %p733_p9, %p732_p7  ;;  %p740_p8 = scmp.lt.u32.totalorder %s731_s10, %s1029_s5 }
  0x63   : > { %p739_p4 = por %p738_p1, %p737_p2 }
  0x64   : > { %p735_p0 = pneg %p734_p12 }
  0x65   : > { %p741_p13 = por %p740_p8, %p739_p4 }
  0x67   : > { %p742_p6 = pnand %p741_p13, %p735_p0 }
  0x69   : > { %745 = shalt.err (!%p742_p6)
}
  0x6a   : > { %s746_s26 = scalar_lea.vmem %s1035_s7, 128  ;;  %s844_s30 = smov [#allocation2]  }
  0x6b   : > { %p747_p10 = scmp.ne.s32.totalorder %s1035_s7, %s746_s26  ;;  %s751_s27 = sshll.u32 %s844_s30, 4  ;;  %s752_s27 = int_to_ptr.vmem [resolvable:$false] %s751_s27 }
  0x6c   : > { %s753_s29 = scalar_lea.vmem %s752_s27, 256  ;;  %p754_p12 = scmp.lt.s32.totalorder %s1035_s7, %s752_s27 }
  0x6d   : > { %p749_p3 = pnand %p747_p10, %p733_p9  ;;  %p755_p2 = scmp.lt.s32.totalorder %s753_s29, %s746_s26 }
  0x6f   : > { %p750_p7 = pneg %p749_p3  ;;  %p756_p1 = por %p755_p2, %p754_p12 }
  0x71   : > { %p757_p4 = pnand %p756_p1, %p750_p7 }
  0x73   : > { %760 = shalt.err (!%p757_p4)
}
  0x74   : > { %591 = dma.hbm_to_vmem [thread:$0]  (!%p1031_p11), %s1029_s5, 128, %s1035_s7, %s193_s28  }
  0x75   : > { %p1151_p0 = scmp.ne.s32.totalorder %s1145_s23, 0 }
  0x76   : > { %s1065_s6 = sand.u32 (!%p1151_p0), 1, %s827_s16   ;;  %p1152_p9 = scmp.ne.s32.totalorder (!%p1151_p0), %s1143_s21, 0 }
  0x77   : > { %212 = sbr.rel (%p1151_p0) target bundleno = 582 (0x246), region = 36  ;;  %s519_s10 = sshll.u32 (!%p1151_p0), %s1065_s6, 3 }
  0x78   : > { %s215_s9 = scalar_lea.sflag (!%p1151_p0), [#allocation3], %s1065_s6  ;;  %s218_s11 = scalar_lea.vmem (!%p1151_p0), [#allocation2], %s519_s10 }
  0x7e   : > { %806 = dma.done.wait (%p1152_p9), %s215_s9, 128  }
  0x7f   : > { %808 = vsyncadd (%p1152_p9), %s215_s9, 4294967168  ;;  %p1153_p11 = scmp.eq.s32.totalorder %s895_s19, 0 }
  0x81   : > { %810 = dma.done.wait (%p1153_p11), [#allocation6], 144   ;;  %p1154_p8 = pmov %p1153_p11 }
  0x83   : > { %812 = vsyncadd (%p1154_p8), [#allocation6], 4294967152  ;;  %p1155_p13 = pmov %p1154_p8 }
  0x84   : > { %p1156_p6 = pmov %p1154_p8 }
  0x85   : > { %814 = dma.done.wait (%p1155_p13), [#allocation9], 512  }
  0x86   : > { %816 = vsyncadd (%p1156_p6), [#allocation9], 4294966784  ;;  %v845_v0 = vmov 0.0   ;;  %vm846_vm0 = vmmov 0   ;;  %v847_v1 = vmov 0.0|0.0   ;;  %v646_v2 = vld [vmem:[#allocation5] sm:$0xff]  }
  0x87   : > { %539 = vmatprep.subr.bf16.mxu0 %v845_v0  ;;  %541 = vmatprep.mubr.msk.bf16.mxu0 %vm846_vm0, %v845_v0  ;;  %v256_v3 = vld [vmem:[%s218_s11] sm:$0xff]  ;;  %vm273_vm1 = vcmask 130048   ;;  %v321_v9 = vld [vmem:[#allocation8 + $0x18] sm:$0xff]  ;;  %vm322_vm2 = vcmask 261120   ;;  %s529_s21 = sshll.u32 %s895_s19, 7  ;;  %s254_s23 = scalar_lea.vmem [#allocation10], %s519_s10 }
  0x88   : > { %556 = vmatprep.subr.bf16.mxu1 %v847_v1  ;;  %553 = vmatprep.mubr.msk.f32.mxu1 %vm846_vm0, %v845_v0  ;;  %v318_v4 = vld [vmem:[#allocation8] sm:$0xff]  ;;  %v319_v5 = vld [vmem:[#allocation8 + $0x8] sm:$0xff]  ;;  %v257_v6 = vpack.c.bf16 %v256_v3, %v256_v3  ;;  %v320_v8 = vld [vmem:[#allocation8 + $0x10] sm:$0xff]  ;;  %s411_s5 = sshll.u32 %s254_s23, 4  ;;  %s1090_s28 = scalar_lea.hbm %s1139_s4, %s529_s21  ;;  %s1092_s5 = int_to_ptr.vmem [resolvable:$true] %s411_s5 }
  0x89   : > { %540 = vmatpush3.bf16.msra.mxu0 %v646_v2  ;;  %v557_v7 = vpack.c.bf16 %v319_v5, %v318_v4  ;;  %v560_v10 = vpack.c.bf16 %v321_v9, %v320_v8  ;;  %v524_v11 = vld [vmem:[#allocation7] ss:$0 sm:$0xff]  ;;  %s398_s12 = scalar_lea.sflag [#allocation4], %s1065_s6  ;;  %s761_s13 = scalar_lea.vmem %s1092_s5, 128 }
  0x8a   : > { %p762_p10 = scmp.ne.s32.totalorder %s1092_s5, %s761_s13  ;;  %s848_s19 = smov [#allocation10]  }
  0x8b   : > { %558 = vmatpush3.bf16.msra.mxu1 %v557_v7  ;;  %s765_s24 = sshll.u32 %s848_s19, 4  ;;  %s766_s24 = int_to_ptr.vmem [resolvable:$false] %s765_s24 }
  0x8c   : > { %542 = vmatmul.mubr.msk.bf16.vlgmr.msra.gmra.mrb[0].mxu0 %vm273_vm1, %v257_v6  ;;  %559 = vmatprep.subr.bf16.mxu1 %v847_v1  ;;  %p763_p3 = pnand %p762_p10, %p1020_p5  ;;  %s767_s26 = scalar_lea.vmem %s766_s24, 256 }
  0x8d   : > { %p768_p12 = scmp.lt.s32.totalorder %s1092_s5, %s766_s24  ;;  %p769_p2 = scmp.lt.s32.totalorder %s767_s26, %s761_s13 }
  0x8e   : > { %p764_p7 = pneg %p763_p3 }
  0x8f   : > { %561 = vmatpush3.bf16.msra.mxu1 %v560_v10  ;;  %p770_p1 = por %p769_p2, %p768_p12 }
  0x91   : > { %p771_p4 = pnand %p770_p1, %p764_p7 }
 0x15f   : > { %v311_v12 = vpop.f32.mrb[0].mxu0 }
 0x160   : > { %v312_v13 = vadd.f32 %v524_v11, %v311_v12  ;;  %v543_v14 = vpop.f32.mrb[1].mxu0 }
 0x161   : > { %v314_v15 = vpop.f32.mrb[2].mxu0 }
 0x162   : > { %v317_v16 = vmax.f32 %v312_v13, 0.0  ;;  %v544_v17 = vpop.f32.mrb[3].mxu0 }
 0x164   : > { %554 = vmatmul.mubr.msk.f32.vlgmr.msra.gmra.mrb[0].mxu1 %vm322_vm2, %v317_v16 }
 0x237   : > { %v392_v18 = vpop.f32.mrb[0].mxu1 }
 0x238   : > { %396 = vst.msk [vmem:[%s254_s23] sm:$0xff] %vm273_vm1, %v392_v18  ;;  %v555_v19 = vpop.f32.mrb[1].mxu1 }
 0x239   : > { %774 = shalt.err (!%p771_p4)
}
 0x23a   : > { %s775_s30 = scalar_lea.hbm %s1090_s28, 128  ;;  %s779_s6 = scalar_lea.hbm %s1139_s4, 256 }
 0x23b   : > { %p776_p0 = scmp.ne.s32.totalorder %s1090_s28, %s775_s30  ;;  %p780_p8 = scmp.lt.u32.totalorder %s1090_s28, %s1139_s4 }
 0x23c   : > { %p781_p13 = scmp.lt.u32.totalorder %s779_s6, %s775_s30  ;;  %p783_p10 = scmp.lt.u32.totalorder %s775_s30, %s1090_s28 }
 0x23d   : > { %p777_p9 = pnand %p776_p0, %p1020_p5 }
 0x23e   : > { %p782_p6 = por %p781_p13, %p780_p8 }
 0x23f   : > { %p778_p11 = pneg %p777_p9 }
 0x240   : > { %p784_p3 = por %p783_p10, %p782_p6 }
 0x242   : > { %p785_p7 = pnand %p784_p3, %p778_p11 }
 0x244   : > { %788 = shalt.err (!%p785_p7)
}
 0x245   : > { %576 = dma.vmem_to_hbm [thread:$0]  (%p1020_p5), %s1092_s5, 128, %s1090_s28, %s398_s12  }
 0x246 PF: > { %s423_s11 = sand.u32 1, %s823_s15   ;;  %p1157_p12 = scmp.ne.s32.totalorder %s1144_s22, 0 }
 0x247   : > { %p1158_p2 = scmp.ge.s32.totalorder %s835_s18, 2  ;;  %s424_s21 = scalar_lea.sflag [#allocation4], %s423_s11 }
 0x249   : > { %p593_p1 = pnand %p1158_p2, %p1157_p12 }
 0x24b   : > { %818 = dma.done.wait (!%p593_p1), %s424_s21, 128  }
 0x24c   : > { %820 = vsyncadd (!%p593_p1), %s424_s21, 4294967168  ;;  %p19_p4 = scmp.ge.s32.totalorder %s1006_s25, 4   ;;  %s1159_s15 = smov %s827_s16 }
 0x24d   : > { %s1160_s16 = smov %s831_s17  ;;  %s1161_s17 = smov %s1016_s14 }
 0x24e   : > { %s1162_s18 = smov %s1006_s25  ;;  %21 = sbr.rel (!%p19_p4) target bundleno = 7 (0x7), region = 93 }
 0x255   :  { %429 = vsyncpa [#allocation3], 1 }
 0x256   :  { %431 = vsyncpa [#allocation3 + $0x1], 1 }
 0x257   :  { %432 = vsyncpa [#allocation6], 1 }
 0x258   :  { %433 = vsyncpa [#allocation9], 1 }
 0x259   :  { %434 = vsyncpa [#allocation4], 1 }
 0x25a   :  { %436 = vsyncpa [#allocation4 + $0x1], 1 }

</bundles_post_ra>
